<compile_context>
chip_gen: v6e
topology: v6e:2x2x1
jax: 0.10.0
libtpu: 0.0.40
codegen_flags: <defaults>
</compile_context>

<pallas_src>
import functools

import jax
import jax.numpy as jnp
from jax import lax
from jax.experimental import pallas as pl
from jax.experimental.pallas import tpu as pltpu

# ---------------- config (small, consistent with the module) ----------------
BATCH = 2
N_VIEWS = 2
NUM_JOINTS = 8            # config.model.backbone.num_joints (must be > 6: base joint index 6)
IMG_H = IMG_W = 64        # images (small analogue of inputImageShape=384)
FEAT_H = FEAT_W = 16      # backbone heatmap/feature resolution (= input/4, like 384 -> 96)
BACKBONE_FEAT_C = 256     # backbone feature channels (process_features = Conv2d(256, 32, 1))
PROC_FEAT_C = 32
VOLUME_SIZE = 8           # config.model.volume_size
CUBOID_SIDE = 250.0       # config.model.cuboid_side
HEATMAP_MULTIPLIER = 100.0
VOLUME_MULTIPLIER = 1.0
# volume_aggregation_method='sum', heatmap_softmax=True, volume_softmax=True


# =============================================================================
# Kernel A: backbone stand-in heads + process_features + integrate_tensor_2d
#   Operates channel-major on one view: pix (3, HW), all matmuls lane-dense on HW=256.
#   Outputs: keypoints_2d (J, 2) and processed features (32, HW) per view.
# =============================================================================
def _backbone_kernel(pix_ref, whmT_ref, bhm_ref, wftT_ref, bft_ref, wpfT_ref, bpf_ref,
                     coords_ref, kp_ref, pf_ref, *, hm_mult):
    pix = pix_ref[...]                                               # (3, HW)

    # ---- heatmap head (no ReLU) + 2D soft-argmax (softmax over flattened H*W) ----
    hm = jnp.dot(whmT_ref[...], pix,
                 preferred_element_type=jnp.float32) + bhm_ref[...]  # (J, HW)
    s = hm * hm_mult
    s = s - jnp.max(s, axis=1, keepdims=True)
    e = jnp.exp(s)
    # coords columns: [x_index (width), y_index (height), 1] per flat pixel
    m = jnp.dot(e, coords_ref[...], preferred_element_type=jnp.float32)   # (J, 3)
    kp_ref[...] = m[:, 0:2] / m[:, 2:3]                                   # (J, 2): (x, y)

    # ---- feature head (ReLU) -> process_features Conv2d(256, 32, 1) ----
    f = jnp.maximum(
        jnp.dot(wftT_ref[...], pix,
                preferred_element_type=jnp.float32) + bft_ref[...], 0.0)  # (256, HW)
    pf_ref[...] = jnp.dot(wpfT_ref[...], f,
                          preferred_element_type=jnp.float32) + bpf_ref[...]  # (32, HW)


def backbone_heads(pix, params, coords2d):
    # pix: (B*V, 3, HW) channel-major pooled pixels. Returns ((B*V, J, 2), (B*V, 32, HW)).
    bv, _, hw = pix.shape
    j = params["w_hm"].shape[1]
    cfeat = params["w_feat"].shape[1]
    cpf = params["w_pf"].shape[1]
    w_hm_t = params["w_hm"].T                       # (J, 3)
    b_hm = params["b_hm"].reshape(j, 1)
    w_ft_t = params["w_feat"].T                     # (256, 3)
    b_ft = params["b_feat"].reshape(cfeat, 1)
    w_pf_t = params["w_pf"].T                       # (32, 256)
    b_pf = params["b_pf"].reshape(cpf, 1)
    return pl.pallas_call(
        functools.partial(_backbone_kernel, hm_mult=HEATMAP_MULTIPLIER),
        out_shape=(jax.ShapeDtypeStruct((bv, j, 2), jnp.float32),
                   jax.ShapeDtypeStruct((bv, cpf, hw), jnp.float32)),
        grid_spec=pltpu.PrefetchScalarGridSpec(
            num_scalar_prefetch=0,
            grid=(bv,),
            in_specs=[
                pl.BlockSpec((None, 3, hw), lambda i: (i, 0, 0)),
                pl.BlockSpec((j, 3), lambda i: (0, 0)),
                pl.BlockSpec((j, 1), lambda i: (0, 0)),
                pl.BlockSpec((cfeat, 3), lambda i: (0, 0)),
                pl.BlockSpec((cfeat, 1), lambda i: (0, 0)),
                pl.BlockSpec((cpf, cfeat), lambda i: (0, 0)),
                pl.BlockSpec((cpf, 1), lambda i: (0, 0)),
                pl.BlockSpec((hw, 3), lambda i: (0, 0)),
            ],
            out_specs=[
                pl.BlockSpec((None, j, 2), lambda i: (i, 0, 0)),
                pl.BlockSpec((None, cpf, hw), lambda i: (i, 0, 0)),
            ],
        ),
        compiler_params=pltpu.CompilerParams(dimension_semantics=("parallel",)),
    )(pix, w_hm_t, b_hm, w_ft_t, b_ft, w_pf_t, b_pf, coords2d)


# =============================================================================
# Kernel B: op.unproject_heatmaps ('sum' over views, bilinear grid_sample with
#           align_corners=True / zero padding) fused with the V2V stand-in
#           (1x1x1 conv -> ReLU -> 1x1x1 conv) and
#           op.integrate_tensor_3d_with_coordinates (softmax over volume + einsum).
#           Bilinear weights are built flat and lane-dense as (G, H*W) one-hot sums,
#           and the sampling is one MXU matmul feat(C,HW) x W(G,HW)^T -> (C,G).
# =============================================================================
def _volume_kernel(feat_ref, projt_ref, grid_ref, w1t_ref, b1_ref, w2t_ref, b2_ref,
                   vol_ref, kp_ref, acc_ref, *, feat_h, feat_w, vol_mult):
    vi = pl.program_id(1)
    nv = pl.num_programs(1)

    @pl.when(vi == 0)
    def _():
        acc_ref[...] = jnp.zeros_like(acc_ref)

    feat = feat_ref[...]                                             # (C, HW)
    p_t = projt_ref[...]                                             # (4, 3) = P^T
    gh = grid_ref[...]                                               # (G, 4) homogeneous coords
    g = gh.shape[0]
    hw = feat_h * feat_w

    # [x, y, z]_homog = [coord, 1] @ P^T
    xyz = (gh[:, 0:1] * p_t[0:1, :] + gh[:, 1:2] * p_t[1:2, :]
           + gh[:, 2:3] * p_t[2:3, :] + gh[:, 3:4] * p_t[3:4, :])    # (G, 3)
    z = xyz[:, 2:3]
    invalid = z <= 0.0
    z = jnp.where(z == 0.0, 1.0, z)
    x = xyz[:, 0:1] / z
    y = xyz[:, 1:2] / z
    # normalization intentionally replicates op.unproject_heatmaps (x by shape[0], y by shape[1]);
    # identical here since feat_h == feat_w.
    xn = 2.0 * (x / feat_h - 0.5)
    yn = 2.0 * (y / feat_w - 0.5)
    # F.grid_sample semantics: grid (x, y); x indexes width, y indexes height
    ix = (xn + 1.0) * 0.5 * (feat_w - 1)
    iy = (yn + 1.0) * 0.5 * (feat_h - 1)
    # clamp before the int cast: avoids int32 overflow for extreme projections; clamped
    # coords are out of range anyway and get zero weight (zero-padding semantics).
    ix = jnp.clip(ix, -2.0, feat_w + 1.0)
    iy = jnp.clip(iy, -2.0, feat_h + 1.0)
    ix0f = jnp.floor(ix)
    iy0f = jnp.floor(iy)
    fx = ix - ix0f
    fy = iy - iy0f
    ix0 = ix0f.astype(jnp.int32)
    iy0 = iy0f.astype(jnp.int32)

    flat = lax.broadcasted_iota(jnp.int32, (g, hw), 1)               # lane-dense flat index
    valid_pt = jnp.logical_not(invalid)                              # (G, 1)

    def corner(row, col, wgt):
        ok = (row >= 0) & (row < feat_h) & (col >= 0) & (col < feat_w) & valid_pt
        idx = row * feat_w + col                                     # (G, 1)
        return (flat == idx).astype(jnp.float32) * jnp.where(ok, wgt, 0.0)

    wmat = (corner(iy0, ix0, (1.0 - fy) * (1.0 - fx))
            + corner(iy0, ix0 + 1, (1.0 - fy) * fx)
            + corner(iy0 + 1, ix0, fy * (1.0 - fx))
            + corner(iy0 + 1, ix0 + 1, fy * fx))                     # (G, HW)

    acc_ref[...] += lax.dot_general(
        feat, wmat, dimension_numbers=(((1,), (1,)), ((), ())),
        preferred_element_type=jnp.float32)                          # (C, G)

    @pl.when(vi == nv - 1)
    def _():
        acc = acc_ref[...]                                           # (C, G)
        # V2V stand-in: 1x1x1 conv -> ReLU -> 1x1x1 conv, channel-major on the voxel axis.
        h1 = jnp.maximum(
            jnp.dot(w1t_ref[...], acc,
                    preferred_element_type=jnp.float32) + b1_ref[...], 0.0)   # (C, G)
        vol = jnp.dot(w2t_ref[...], h1,
                      preferred_element_type=jnp.float32) + b2_ref[...]       # (J, G)
        vol_ref[...] = vol
        # integrate_tensor_3d_with_coordinates (softmax over G, expectation of coords)
        v_sm = vol * vol_mult
        v_sm = v_sm - jnp.max(v_sm, axis=1, keepdims=True)
        e = jnp.exp(v_sm)
        p = e / jnp.sum(e, axis=1, keepdims=True)
        kp_ref[...] = jnp.dot(p, gh[:, 0:3], preferred_element_type=jnp.float32)  # (J, 3)


def unproject_v2v_integrate(feat_flat, proj_t, grid_h, params):
    # feat_flat: (B, V, C, HW); proj_t: (B, V, 4, 3); grid_h: (B, G, 4)
    # -> (volumes (B, J, G), vol_keypoints_3d (B, J, 3))
    b, v, c, hw = feat_flat.shape
    g = grid_h.shape[1]
    j = params["w_v2"].shape[1]
    w1t = params["w_v1"].T                          # (C, C)
    b1 = params["b_v1"].reshape(c, 1)
    w2t = params["w_v2"].T                          # (J, C)
    b2 = params["b_v2"].reshape(j, 1)
    return pl.pallas_call(
        functools.partial(_volume_kernel, feat_h=FEAT_H, feat_w=FEAT_W,
                          vol_mult=VOLUME_MULTIPLIER),
        out_shape=(jax.ShapeDtypeStruct((b, j, g), jnp.float32),
                   jax.ShapeDtypeStruct((b, j, 3), jnp.float32)),
        grid_spec=pltpu.PrefetchScalarGridSpec(
            num_scalar_prefetch=0,
            grid=(b, v),
            in_specs=[
                pl.BlockSpec((None, None, c, hw), lambda bi, vi: (bi, vi, 0, 0)),
                pl.BlockSpec((None, None, 4, 3), lambda bi, vi: (bi, vi, 0, 0)),
                pl.BlockSpec((None, g, 4), lambda bi, vi: (bi, 0, 0)),
                pl.BlockSpec((c, c), lambda bi, vi: (0, 0)),
                pl.BlockSpec((c, 1), lambda bi, vi: (0, 0)),
                pl.BlockSpec((j, c), lambda bi, vi: (0, 0)),
                pl.BlockSpec((j, 1), lambda bi, vi: (0, 0)),
            ],
            out_specs=[
                pl.BlockSpec((None, j, g), lambda bi, vi: (bi, 0, 0)),
                pl.BlockSpec((None, j, 3), lambda bi, vi: (bi, 0, 0)),
            ],
            scratch_shapes=[pltpu.VMEM((c, g), jnp.float32)],
        ),
        compiler_params=pltpu.CompilerParams(
            dimension_semantics=("parallel", "arbitrary")),
    )(feat_flat, proj_t, grid_h, w1t, b1, w2t, b2)


# =============================================================================
# Plain-JAX glue: DLT triangulation (SVD) and coordinate-volume construction
# =============================================================================
def triangulate_batch_of_points(proj_matricies, points_2d):
    # proj_matricies: (B, V, 3, 4); points_2d: (B, V, J, 2) -> (B, J, 3)
    def one_point(projs, pts):                                     # (V,3,4), (V,2)
        a = projs[:, 2:3, :] * pts[:, :, None] - projs[:, :2, :]   # (V, 2, 4)
        a = a.reshape(-1, 4)
        _, _, vh = jnp.linalg.svd(a, full_matrices=True)           # TODO(synk): SVD stays in XLA (no Pallas equivalent)
        ph = -vh[3, :]                                             # torch: -v[:, 3]
        return ph[:3] / ph[3]

    pts_t = jnp.transpose(points_2d, (0, 2, 1, 3))                 # (B, J, V, 2)
    per_joint = jax.vmap(one_point, in_axes=(None, 0))
    per_batch = jax.vmap(per_joint, in_axes=(0, 0))
    return per_batch(proj_matricies, pts_t)


def build_coord_volumes(base_point):
    vs = VOLUME_SIZE
    sides = jnp.array([CUBOID_SIDE, CUBOID_SIDE, CUBOID_SIDE], dtype=jnp.float32)
    position = base_point - sides / 2.0
    ar = jnp.arange(vs, dtype=jnp.float32)
    xxx, yyy, zzz = jnp.meshgrid(ar, ar, ar, indexing="ij")        # torch.meshgrid default 'ij'
    grid = jnp.stack([xxx, yyy, zzz], axis=-1).reshape(-1, 3)
    grid_coord = position[None, :] + (sides / (vs - 1))[None, :] * grid
    one = grid_coord.reshape(vs, vs, vs, 3)
    # original forward uses keypoints_3d_Alg[0] for EVERY batch item -> identical per-batch volumes
    return jnp.broadcast_to(one[None], (BATCH, vs, vs, vs, 3))


# =============================================================================
# Parameters (deterministic synthetic init)
# =============================================================================
def init_params(key):
    ks = jax.random.split(key, 8)

    def w(k, shape, scale):
        return scale * jax.random.normal(k, shape, dtype=jnp.float32)

    return {
        # TODO(synk): full pose_resnet backbone not reproduced; stand-in = avgpool(/4) + 1x1 conv heads.
        "w_hm": w(ks[0], (3, NUM_JOINTS), 0.5),
        "b_hm": w(ks[1], (NUM_JOINTS,), 0.1),
        "w_feat": w(ks[2], (3, BACKBONE_FEAT_C), 0.5),
        "b_feat": w(ks[3], (BACKBONE_FEAT_C,), 0.1),
        # process_features = nn.Conv2d(256, 32, kernel_size=1)
        "w_pf": w(ks[4], (BACKBONE_FEAT_C, PROC_FEAT_C), 0.05),
        "b_pf": w(ks[5], (PROC_FEAT_C,), 0.1),
        # TODO(synk): full V2VModel encoder-decoder not reproduced; stand-in = two 1x1x1 conv3d layers.
        "w_v1": w(ks[6], (PROC_FEAT_C, PROC_FEAT_C), 0.2),
        "b_v1": jnp.zeros((PROC_FEAT_C,), jnp.float32),
        "w_v2": w(ks[7], (PROC_FEAT_C, NUM_JOINTS), 0.2),
        "b_v2": jnp.zeros((NUM_JOINTS,), jnp.float32),
    }


# =============================================================================
# Forward (mirrors VolumetricTriangulationNet2.forward)
# =============================================================================
def volumetric_triangulation_forward(params, images, proj_matricies):
    b, v = images.shape[:2]
    j = NUM_JOINTS
    vs = VOLUME_SIZE
    g = vs ** 3
    fh, fw = FEAT_H, FEAT_W
    hw = fh * fw

    # ---- backbone stand-in pooling (channel-major, contiguous -> no relayout downstream) ----
    imgs = images.reshape(b * v, *images.shape[2:])
    stride = imgs.shape[2] // fh
    pooled = imgs.reshape(b * v, 3, fh, stride, fw, stride).mean(axis=(3, 5))  # (BV, 3, fh, fw)
    pix = pooled.reshape(b * v, 3, hw)                                         # (BV, 3, HW)

    # flat-pixel coordinate matrix for the 2D soft-argmax: [x(col), y(row), 1]
    xi = jnp.tile(jnp.arange(fw, dtype=jnp.float32), fh)
    yi = jnp.repeat(jnp.arange(fh, dtype=jnp.float32), fw)
    coords2d = jnp.stack([xi, yi, jnp.ones_like(xi)], axis=1)                  # (HW, 3)

    # ---- Kernel A: heads + process_features + integrate_tensor_2d ----
    kp2d, pf = backbone_heads(pix, params, coords2d)        # (BV, J, 2), (BV, 32, HW)
    keypoints_2d = kp2d.reshape(b, v, j, 2)
    features_p = pf.reshape(b, v, PROC_FEAT_C, fh, fw)      # module's `features` output (NCHW)

    # ---- multiview.triangulate_batch_of_points ----
    keypoints_3d_alg = triangulate_batch_of_points(proj_matricies, keypoints_2d)   # (B, J, 3)

    # ---- coordinate volumes (base point = joint 6 of batch 0, like the original) ----
    base_point = lax.stop_gradient(keypoints_3d_alg[0, 6, :3])
    coord_volumes = build_coord_volumes(base_point)                                 # (B,vs,vs,vs,3)
    coords_flat = coord_volumes.reshape(b, g, 3)
    grid_h = jnp.concatenate([coords_flat, jnp.ones((b, g, 1), jnp.float32)], axis=-1)

    # ---- Kernel B: unproject (sum over views) + V2V stand-in + integrate_3d ----
    proj_t = jnp.transpose(proj_matricies, (0, 1, 3, 2))                             # (B, V, 4, 3)
    feat_flat = pf.reshape(b, v, PROC_FEAT_C, hw)                                    # free reshape
    volumes, vol_keypoints_3d = unproject_v2v_integrate(feat_flat, proj_t, grid_h, params)

    volumes_out = volumes.reshape(b, j, vs, vs, vs)
    return vol_keypoints_3d, features_p, volumes_out, coord_volumes


if __name__ == "__main__":
    key = jax.random.PRNGKey(0)
    k_img, k_proj, k_par = jax.random.split(key, 3)
    images = jax.random.normal(k_img, (BATCH, N_VIEWS, 3, IMG_H, IMG_W), dtype=jnp.float32)
    proj_matricies = jax.random.normal(k_proj, (BATCH, N_VIEWS, 3, 4), dtype=jnp.float32)
    params = init_params(k_par)

    outs = volumetric_triangulation_forward(params, images, proj_matricies)
    jax.tree_util.tree_map(jax.block_until_ready, outs)
    print("KERNEL_OK")
</pallas_src>

<mosaic_0001>
module attributes {stable_mosaic.version = 11 : i64} {
  func.func @_backbone_kernel(%arg0: i32, %arg1: memref<1x3x256xf32, #tpu.memory_space<vmem>>, %arg2: memref<8x3xf32, #tpu.memory_space<vmem>>, %arg3: memref<8x1xf32, #tpu.memory_space<vmem>>, %arg4: memref<256x3xf32, #tpu.memory_space<vmem>>, %arg5: memref<256x1xf32, #tpu.memory_space<vmem>>, %arg6: memref<32x256xf32, #tpu.memory_space<vmem>>, %arg7: memref<32x1xf32, #tpu.memory_space<vmem>>, %arg8: memref<256x3xf32, #tpu.memory_space<vmem>>, %arg9: memref<1x8x2xf32, #tpu.memory_space<vmem>>, %arg10: memref<1x32x256xf32, #tpu.memory_space<vmem>>) attributes {dimension_semantics = [#tpu.dimension_semantics<parallel>], iteration_bounds = array<i64: 4>, scalar_prefetch = 0 : i64, scratch_operands = 0 : i64, tpu.core_type = #tpu.core_type<tc>, window_params = [{transform_indices = @transform_0, window_bounds = array<i64: 1, 3, 256>}, {pipeline_mode = #tpu.pipeline_mode<synchronous>, transform_indices = @transform_1, window_bounds = array<i64: 8, 3>}, {pipeline_mode = #tpu.pipeline_mode<synchronous>, transform_indices = @transform_2, window_bounds = array<i64: 8, 1>}, {pipeline_mode = #tpu.pipeline_mode<synchronous>, transform_indices = @transform_3, window_bounds = array<i64: 256, 3>}, {pipeline_mode = #tpu.pipeline_mode<synchronous>, transform_indices = @transform_4, window_bounds = array<i64: 256, 1>}, {pipeline_mode = #tpu.pipeline_mode<synchronous>, transform_indices = @transform_5, window_bounds = array<i64: 32, 256>}, {pipeline_mode = #tpu.pipeline_mode<synchronous>, transform_indices = @transform_6, window_bounds = array<i64: 32, 1>}, {pipeline_mode = #tpu.pipeline_mode<synchronous>, transform_indices = @transform_7, window_bounds = array<i64: 256, 3>}, {transform_indices = @transform_8, window_bounds = array<i64: 1, 8, 2>}, {transform_indices = @transform_9, window_bounds = array<i64: 1, 32, 256>}]} {
    %c0 = arith.constant 0 : index
    %c0_0 = arith.constant 0 : index
    %c0_1 = arith.constant 0 : index
    %0 = vector.load %arg1[%c0, %c0_0, %c0_1] : memref<1x3x256xf32, #tpu.memory_space<vmem>>, vector<1x3x256xf32>
    %1 = vector.shape_cast %0 : vector<1x3x256xf32> to vector<3x256xf32>
    %c0_2 = arith.constant 0 : index
    %c0_3 = arith.constant 0 : index
    %2 = vector.load %arg2[%c0_2, %c0_3] : memref<8x3xf32, #tpu.memory_space<vmem>>, vector<8x3xf32>
    %cst = arith.constant dense<0.000000e+00> : vector<8x256xf32>
    %3 = tpu.matmul %2, %1, %cst {dimension_numbers = #tpu.dot_dimension_numbers<[1], [0], [0], [1], [0, 0, 1, 1], [], []>} : vector<8x3xf32>, vector<3x256xf32>, vector<8x256xf32> -> vector<8x256xf32>
    %c0_4 = arith.constant 0 : index
    %c0_5 = arith.constant 0 : index
    %4 = vector.load %arg3[%c0_4, %c0_5] : memref<8x1xf32, #tpu.memory_space<vmem>>, vector<8x1xf32>
    %5 = vector.broadcast %4 : vector<8x1xf32> to vector<8x256xf32>
    %6 = arith.addf %3, %5 : vector<8x256xf32>
    %cst_6 = arith.constant 1.000000e+02 : f32
    %7 = vector.broadcast %cst_6 : f32 to vector<8x256xf32>
    %8 = arith.mulf %6, %7 : vector<8x256xf32>
    %cst_7 = arith.constant dense<0xFF800000> : vector<8xf32>
    %9 = vector.multi_reduction <maximumf>, %8, %cst_7 [1] : vector<8x256xf32> to vector<8xf32>
    %10 = vector.shape_cast %9 : vector<8xf32> to vector<8x1xf32>
    %11 = vector.broadcast %10 : vector<8x1xf32> to vector<8x256xf32>
    %12 = arith.subf %8, %11 : vector<8x256xf32>
    %13 = math.exp %12 : vector<8x256xf32>
    %c0_8 = arith.constant 0 : index
    %c0_9 = arith.constant 0 : index
    %14 = vector.load %arg8[%c0_8, %c0_9] : memref<256x3xf32, #tpu.memory_space<vmem>>, vector<256x3xf32>
    %cst_10 = arith.constant dense<0.000000e+00> : vector<8x3xf32>
    %15 = tpu.matmul %13, %14, %cst_10 {dimension_numbers = #tpu.dot_dimension_numbers<[1], [0], [0], [1], [0, 0, 1, 1], [], []>} : vector<8x256xf32>, vector<256x3xf32>, vector<8x3xf32> -> vector<8x3xf32>
    %16 = vector.extract_strided_slice %15 {offsets = [0, 0], sizes = [8, 2], strides = [1, 1]} : vector<8x3xf32> to vector<8x2xf32>
    %17 = vector.extract_strided_slice %15 {offsets = [0, 2], sizes = [8, 1], strides = [1, 1]} : vector<8x3xf32> to vector<8x1xf32>
    %18 = vector.broadcast %17 : vector<8x1xf32> to vector<8x2xf32>
    %19 = arith.divf %16, %18 : vector<8x2xf32>
    %c0_11 = arith.constant 0 : index
    %c0_12 = arith.constant 0 : index
    %c0_13 = arith.constant 0 : index
    %20 = vector.load %arg9[%c0_11, %c0_12, %c0_13] : memref<1x8x2xf32, #tpu.memory_space<vmem>>, vector<1x8x2xf32>
    %21 = vector.shape_cast %20 : vector<1x8x2xf32> to vector<8x2xf32>
    %22 = vector.shape_cast %19 : vector<8x2xf32> to vector<1x8x2xf32>
    tpu.vector_store %arg9[%c0_11, %c0_12, %c0_13], %22 {strides = array<i32>} : memref<1x8x2xf32, #tpu.memory_space<vmem>>, vector<1x8x2xf32>,
    %c0_14 = arith.constant 0 : index
    %c0_15 = arith.constant 0 : index
    %23 = vector.load %arg4[%c0_14, %c0_15] : memref<256x3xf32, #tpu.memory_space<vmem>>, vector<256x3xf32>
    %cst_16 = arith.constant dense<0.000000e+00> : vector<256x256xf32>
    %24 = tpu.matmul %23, %1, %cst_16 {dimension_numbers = #tpu.dot_dimension_numbers<[1], [0], [0], [1], [0, 0, 1, 1], [], []>} : vector<256x3xf32>, vector<3x256xf32>, vector<256x256xf32> -> vector<256x256xf32>
    %c0_17 = arith.constant 0 : index
    %c0_18 = arith.constant 0 : index
    %25 = vector.load %arg5[%c0_17, %c0_18] : memref<256x1xf32, #tpu.memory_space<vmem>>, vector<256x1xf32>
    %26 = vector.broadcast %25 : vector<256x1xf32> to vector<256x256xf32>
    %27 = arith.addf %24, %26 : vector<256x256xf32>
    %cst_19 = arith.constant 0.000000e+00 : f32
    %28 = vector.broadcast %cst_19 : f32 to vector<256x256xf32>
    %29 = arith.maximumf %27, %28 : vector<256x256xf32>
    %c0_20 = arith.constant 0 : index
    %c0_21 = arith.constant 0 : index
    %30 = vector.load %arg6[%c0_20, %c0_21] : memref<32x256xf32, #tpu.memory_space<vmem>>, vector<32x256xf32>
    %cst_22 = arith.constant dense<0.000000e+00> : vector<32x256xf32>
    %31 = tpu.matmul %30, %29, %cst_22 {dimension_numbers = #tpu.dot_dimension_numbers<[1], [0], [0], [1], [0, 0, 1, 1], [], []>} : vector<32x256xf32>, vector<256x256xf32>, vector<32x256xf32> -> vector<32x256xf32>
    %c0_23 = arith.constant 0 : index
    %c0_24 = arith.constant 0 : index
    %32 = vector.load %arg7[%c0_23, %c0_24] : memref<32x1xf32, #tpu.memory_space<vmem>>, vector<32x1xf32>
    %33 = vector.broadcast %32 : vector<32x1xf32> to vector<32x256xf32>
    %34 = arith.addf %31, %33 : vector<32x256xf32>
    %c0_25 = arith.constant 0 : index
    %c0_26 = arith.constant 0 : index
    %c0_27 = arith.constant 0 : index
    %35 = vector.load %arg10[%c0_25, %c0_26, %c0_27] : memref<1x32x256xf32, #tpu.memory_space<vmem>>, vector<1x32x256xf32>
    %36 = vector.shape_cast %35 : vector<1x32x256xf32> to vector<32x256xf32>
    %37 = vector.shape_cast %34 : vector<32x256xf32> to vector<1x32x256xf32>
    tpu.vector_store %arg10[%c0_25, %c0_26, %c0_27], %37 {strides = array<i32>} : memref<1x32x256xf32, #tpu.memory_space<vmem>>, vector<1x32x256xf32>,
    return
  }
  func.func @transform_0(%arg0: i32) -> (i32, i32, i32) {
    %c0_i32 = arith.constant 0 : i32
    %c0_i32_0 = arith.constant 0 : i32
    %c0_i32_1 = arith.constant 0 : i32
    return %arg0, %c0_i32, %c0_i32_0 : i32, i32, i32
  }
  func.func @transform_1(%arg0: i32) -> (i32, i32) {
    %c0_i32 = arith.constant 0 : i32
    %c0_i32_0 = arith.constant 0 : i32
    %c0_i32_1 = arith.constant 0 : i32
    return %c0_i32, %c0_i32_0 : i32, i32
  }
  func.func @transform_2(%arg0: i32) -> (i32, i32) {
    %c0_i32 = arith.constant 0 : i32
    %c0_i32_0 = arith.constant 0 : i32
    %c0_i32_1 = arith.constant 0 : i32
    return %c0_i32, %c0_i32_0 : i32, i32
  }
  func.func @transform_3(%arg0: i32) -> (i32, i32) {
    %c0_i32 = arith.constant 0 : i32
    %c0_i32_0 = arith.constant 0 : i32
    %c0_i32_1 = arith.constant 0 : i32
    return %c0_i32, %c0_i32_0 : i32, i32
  }
  func.func @transform_4(%arg0: i32) -> (i32, i32) {
    %c0_i32 = arith.constant 0 : i32
    %c0_i32_0 = arith.constant 0 : i32
    %c0_i32_1 = arith.constant 0 : i32
    return %c0_i32, %c0_i32_0 : i32, i32
  }
  func.func @transform_5(%arg0: i32) -> (i32, i32) {
    %c0_i32 = arith.constant 0 : i32
    %c0_i32_0 = arith.constant 0 : i32
    %c0_i32_1 = arith.constant 0 : i32
    return %c0_i32, %c0_i32_0 : i32, i32
  }
  func.func @transform_6(%arg0: i32) -> (i32, i32) {
    %c0_i32 = arith.constant 0 : i32
    %c0_i32_0 = arith.constant 0 : i32
    %c0_i32_1 = arith.constant 0 : i32
    return %c0_i32, %c0_i32_0 : i32, i32
  }
  func.func @transform_7(%arg0: i32) -> (i32, i32) {
    %c0_i32 = arith.constant 0 : i32
    %c0_i32_0 = arith.constant 0 : i32
    %c0_i32_1 = arith.constant 0 : i32
    return %c0_i32, %c0_i32_0 : i32, i32
  }
  func.func @transform_8(%arg0: i32) -> (i32, i32, i32) {
    %c0_i32 = arith.constant 0 : i32
    %c0_i32_0 = arith.constant 0 : i32
    %c0_i32_1 = arith.constant 0 : i32
    return %arg0, %c0_i32, %c0_i32_0 : i32, i32, i32
  }
  func.func @transform_9(%arg0: i32) -> (i32, i32, i32) {
    %c0_i32 = arith.constant 0 : i32
    %c0_i32_0 = arith.constant 0 : i32
    %c0_i32_1 = arith.constant 0 : i32
    return %arg0, %c0_i32, %c0_i32_0 : i32, i32, i32
  }
}

</mosaic_0001>

<bundles_post_ra>
// kernel: tpu_custom_call.1
= control target key start
LH: loop header
LB: loop body
LE: loop exit
PB: predicated region body
PF: predicated region fallthrough
CT: control target
= control target key end

     0   :  { %15 = vsyncpa [#allocation3], 0  ;;  %s2415_s0 = inlined_call_operand.vmem [shape: f32[4,3,256], index: 0, kind: input, shape index: {}]   ;;  %s2416_s1 = inlined_call_operand.vmem [shape: f32[8,3], index: 1, kind: input, shape index: {}]   ;;  %s2417_s2 = inlined_call_operand.vmem [shape: f32[8,1], index: 2, kind: input, shape index: {}]   ;;  %s2418_s3 = inlined_call_operand.vmem [shape: f32[256,3], index: 3, kind: input, shape index: {}]   ;;  %s2419_s4 = inlined_call_operand.vmem [shape: f32[256,1], index: 4, kind: input, shape index: {}]   ;;  %s2420_s5 = inlined_call_operand.vmem [shape: f32[32,256], index: 5, kind: input, shape index: {}]   ;;  %s2421_s6 = inlined_call_operand.vmem [shape: f32[32,1], index: 6, kind: input, shape index: {}]   ;;  %s2422_s7 = inlined_call_operand.vmem [shape: f32[256,3], index: 7, kind: input, shape index: {}]   ;;  %s2423_s8 = inlined_call_operand.vmem [shape: f32[4,8,2], index: 8, kind: output, shape index: {0}]   ;;  %s2424_s9 = inlined_call_operand.hbm [shape: f32[4,32,256], index: 9, kind: output, shape index: {1}]  }
   0x1   :  { %17 = vsyncpa [#allocation3 + $0x1], 0  ;;  %s1691_s30 = smov 0   ;;  %s1693_s10 = smov 0  }
   0x2   :  { %s1695_s11 = smov 0   ;;  %s1697_s12 = smov 0  }
   0x3 LB: > { %s1712_s13 = sadd.s32 4294967295, %s1633_s12   ;;  %s1431_s14 = sadd.s32 4294967294, %s1633_s12   ;;  %s1633_s12 = sphi %s1697_s12, %s2466_s12   ;;  %s1629_s11 = sphi %s1695_s11, %s2465_s11   ;;  %s1625_s10 = sphi %s1693_s10, %s2464_s10   ;;  %s1621_s30 = sphi %s1691_s30, %s2463_s30  }
   0x4   : > { %s1716_s15 = sadd.s32 1, %s1633_s12   ;;  %s229_s16 = sadd.s32 1, %s1629_s11 }
   0x5   : > { %s226_s17 = ssub.s32 %s1633_s12, %s1716_s15  ;;  %p239_p0 = scmp.ne.s32.totalorder %s1629_s11, %s1625_s10 }
   0x6   : > { %p227_p1 = scmp.eq.s32.totalorder %s226_s17, 0  ;;  %p240_p2 = scmp.eq.s32.totalorder %s1712_s13, 3 }
   0x7   : > { %p245_p3 = scmp.ne.s32.totalorder %s1625_s10, %s1621_s30  ;;  %p246_p4 = scmp.eq.s32.totalorder %s1431_s14, 3 }
   0x8   : > { %s1727_s18 = scalar_select %p227_p1, %s1629_s11, %s229_s16  }
   0x9   : > { %p1729_p5 = por %p240_p2, %p239_p0  ;;  %p1733_p6 = por %p246_p4, %p245_p3 }
   0xa   : > { %p1434_p7 = scmp.ge.s32.totalorder %s1633_s12, 1  ;;  %p293_p8 = scmp.lt.s32.totalorder %s1633_s12, 5 }
   0xc   : > { %p294_p9 = pnand %p1434_p7, %p293_p8 }
   0xe   : > { %297 = sbr.rel (%p294_p9) target bundleno = 734 (0x2de), region = 52 }
  0x13   : > { %p333_p10 = scmp.lt.s32.totalorder %s1712_s13, 3  ;;  %v1635_v0 = vmov 0.0   ;;  %v2425_v1 = vmov 0   ;;  %v344_v2 = vld [vmem:[%s2417_s2] sm:$0xff]  ;;  %vm356_vm0 = vcmask 1042432   ;;  %vm352_vm1 = vcmask 23552  }
  0x14   : > { %425 = vmatprep.mubr.f32.mxu1 %v1635_v0  ;;  %938 = vmatprep.mubr.f32.mxu0 %v1635_v0  ;;  %v343_v5 = vld [vmem:[%s2416_s1] sm:$0xff]  ;;  %v601_v7 = vld [vmem:[%s2419_s4 + $0x78] sm:$0xff]  ;;  %v555_v8 = vld [vmem:[%s2418_s3 + $0x8] sm:$0xff]  ;;  %s330_s26 = sand.u32 1, %s1625_s10   ;;  %s1482_s29 = sshll.u32 %s1712_s13, 10 }
  0x15   : > { %s1743_s21 = scalar_select %p333_p10, %s1712_s13, 3  ;;  %1562 = vset.pattern.permute.xlu0 %v2425_v1  ;;  %1563 = vset.pattern.permute.xlu1 %v2425_v1  ;;  %v554_v6 = vld [vmem:[%s2418_s3] sm:$0xff]  ;;  %v600_v9 = vld [vmem:[%s2419_s4 + $0x70] sm:$0xff]  ;;  %v599_v11 = vld [vmem:[%s2419_s4 + $0x68] sm:$0xff] }
  0x16   : > { %347 = vperm.xlu0 %1562, %v344_v2   ;;  %695 = vperm.xlu1 %1563, %v601_v7   ;;  %v556_v10 = vld [vmem:[%s2418_s3 + $0x10] sm:$0xff]  ;;  %v557_v12 = vld [vmem:[%s2418_s3 + $0x18] sm:$0xff]  ;;  %v598_v13 = vld [vmem:[%s2419_s4 + $0x60] sm:$0xff]  ;;  %s2363_s23 = scalar_lea.hbm %s2424_s9, %s1482_s29  ;;  %s2369_s24 = scalar_lea.sflag [#allocation3], %s330_s26 }
  0x17   : > { %s2426_s22 = sshll.u32 %s1743_s21, 3  ;;  %v558_v14 = vld [vmem:[%s2418_s3 + $0x20] sm:$0xff]  ;;  %v597_v15 = vld [vmem:[%s2419_s4 + $0x58] sm:$0xff]  ;;  %v559_v16 = vld [vmem:[%s2418_s3 + $0x28] sm:$0xff]  ;;  %s1638_s25 = smov [#allocation2]  }
  0x18   : > { %s337_s27 = scalar_lea.vmem %s2415_s0, %s2426_s22  ;;  %v596_v17 = vld [vmem:[%s2419_s4 + $0x50] sm:$0xff]  ;;  %v595_v19 = vld [vmem:[%s2419_s4 + $0x48] sm:$0xff]  ;;  %v561_v20 = vld [vmem:[%s2418_s3 + $0x38] sm:$0xff] }
  0x19   : > { %v342_v3 = vld [vmem:[%s337_s27] sm:$0x77]  ;;  %v560_v18 = vld [vmem:[%s2418_s3 + $0x30] sm:$0xff]  ;;  %v593_v23 = vld [vmem:[%s2419_s4 + $0x38] sm:$0xff]  ;;  %s1435_s27 = sshll.u32 %s330_s26, 6 }
  0x1a   : > { %v351_v4 = vcombine.high %v342_v3, %v342_v3  ;;  %690 = vperm.xlu1 %1563, %v600_v9   ;;  %v594_v21 = vld [vmem:[%s2419_s4 + $0x40] sm:$0xff]  ;;  %v563_v24 = vld [vmem:[%s2418_s3 + $0x48] sm:$0xff]  ;;  %v564_v26 = vld [vmem:[%s2418_s3 + $0x50] sm:$0xff]  ;;  %s332_s28 = scalar_lea.vmem [#allocation2], %s1435_s27  ;;  %s1577_s27 = sshll.u32 %s1638_s25, 4  ;;  %s1578_s27 = int_to_ptr.vmem [resolvable:$false] %s1577_s27 }
  0x1b   : > { %v562_v22 = vld [vmem:[%s2418_s3 + $0x40] sm:$0xff]  ;;  %v591_v25 = vld [vmem:[%s2419_s4 + $0x28] sm:$0xff]  ;;  %v565_v28 = vld [vmem:[%s2418_s3 + $0x58] sm:$0xff]  ;;  %s1345_s14 = sshll.u32 %s332_s28, 4  ;;  %s1579_s29 = scalar_lea.vmem %s1578_s27, 2048  ;;  %s2365_s14 = int_to_ptr.vmem [resolvable:$true] %s1345_s14 }
  0x1c   : > { %1439 = vmatprep.subr.msk.mxu1 %vm356_vm0, %v351_v4  ;;  %1442 = vmatprep.subr.msk.mxu0 %vm356_vm0, %v351_v4  ;;  %v590_v27 = vld [vmem:[%s2419_s4 + $0x20] sm:$0xff]  ;;  %v589_v29 = vld [vmem:[%s2419_s4 + $0x18] sm:$0xff]  ;;  %v588_v31 = vld [vmem:[%s2419_s4 + $0x10] sm:$0xff]  ;;  %s1573_s13 = scalar_lea.vmem %s2365_s14, 1024  ;;  %p1580_p0 = scmp.lt.s32.totalorder %s2365_s14, %s1578_s27 }
  0x1d   : > { %1440 = vmatpush1.msk.msra.mxu1 %vm356_vm0, %v342_v3  ;;  %1443 = vmatpush1.msk.msra.mxu0 %vm356_vm0, %v342_v3  ;;  %v566_v30 = vld [vmem:[%s2418_s3 + $0x60] sm:$0xff]  ;;  %v567_v32 = vld [vmem:[%s2418_s3 + $0x68] sm:$0xff]  ;;  %v568_v33 = vld [vmem:[%s2418_s3 + $0x70] sm:$0xff]  ;;  %p1574_p11 = scmp.ne.s32.totalorder %s2365_s14, %s1573_s13  ;;  %p1581_p1 = scmp.lt.s32.totalorder %s1579_s29, %s1573_s13 }
  0x1e   : > { %1441 = vmatmul.mubr.msk.f32.vlgmr.msra.gmra.mxu1 %vm352_vm1, %v343_v5  ;;  %1444 = vmatmul.mubr.msk.f32.vlgmr.msra.gmra.mxu0 %vm352_vm1, %v554_v6  ;;  %v569_v34 = vld [vmem:[%s2418_s3 + $0x78] sm:$0xff]  ;;  %v570_v35 = vld [vmem:[%s2418_s3 + $0x80] sm:$0xff]  ;;  %v571_v36 = vld [vmem:[%s2418_s3 + $0x88] sm:$0xff] }
  0x1f   : > { %944 = vmatprep.mubr.f32.mxu0 %v1635_v0  ;;  %685 = vperm.xlu1 %1563, %v599_v11   ;;  %v587_v37 = vld [vmem:[%s2419_s4 + $0x8] sm:$0xff]  ;;  %v572_v38 = vld [vmem:[%s2418_s3 + $0x90] sm:$0xff]  ;;  %v586_v39 = vld [vmem:[%s2419_s4] sm:$0xff]  ;;  %p1575_p12 = pnand %p1574_p11, %p1729_p5  ;;  %p1582_p2 = por %p1581_p1, %p1580_p0 }
  0x20   : > { %v573_v40 = vld [vmem:[%s2418_s3 + $0x98] sm:$0xff]  ;;  %v574_v41 = vld [vmem:[%s2418_s3 + $0xa0] sm:$0xff]  ;;  %v575_v42 = vld [vmem:[%s2418_s3 + $0xa8] sm:$0xff] }
  0x21   : > { %v576_v43 = vld [vmem:[%s2418_s3 + $0xb0] sm:$0xff]  ;;  %v577_v44 = vld [vmem:[%s2418_s3 + $0xb8] sm:$0xff]  ;;  %v578_v45 = vld [vmem:[%s2418_s3 + $0xc0] sm:$0xff]  ;;  %p1576_p13 = pneg %p1575_p12 }
  0x22   : > { %1445 = vmatmul.mubr.msk.f32.gmra.mxu0 %vm352_vm1, %v555_v8  ;;  %v616_v46 = vld [vmem:[%s2419_s4 + $0xf0] sm:$0xff]  ;;  %v579_v47 = vld [vmem:[%s2418_s3 + $0xc8] sm:$0xff]  ;;  %v614_v48 = vld [vmem:[%s2419_s4 + $0xe0] sm:$0xff] }
  0x23   : > { %950 = vmatprep.mubr.f32.mxu0 %v1635_v0  ;;  %680 = vperm.xlu1 %1563, %v598_v13   ;;  %v580_v49 = vld [vmem:[%s2418_s3 + $0xd0] sm:$0xff]  ;;  %v581_v51 = vld [vmem:[%s2418_s3 + $0xd8] sm:$0xff]  ;;  %v610_v52 = vld [vmem:[%s2419_s4 + $0xc0] sm:$0xff]  ;;  %p1583_p3 = pnand %p1582_p2, %p1576_p13 }
  0x24   : > { %v612_v50 = vld [vmem:[%s2419_s4 + $0xd0] sm:$0xff]  ;;  %v582_v53 = vld [vmem:[%s2418_s3 + $0xe0] sm:$0xff]  ;;  %v583_v55 = vld [vmem:[%s2418_s3 + $0xe8] sm:$0xff] }
  0x25   : > { %v608_v54 = vld [vmem:[%s2419_s4 + $0xb0] sm:$0xff]  ;;  %v606_v56 = vld [vmem:[%s2419_s4 + $0xa0] sm:$0xff]  ;;  %v585_v59 = vld [vmem:[%s2418_s3 + $0xf8] sm:$0xff] }
  0x26   : > { %1446 = vmatmul.mubr.msk.f32.gmra.mxu0 %vm352_vm1, %v556_v10  ;;  %v584_v57 = vld [vmem:[%s2418_s3 + $0xf0] sm:$0xff]  ;;  %v602_v60 = vld [vmem:[%s2419_s4 + $0x80] sm:$0xff]  ;;  %v1204_v62 = vld [vmem:[%s2421_s6 + $0x8] sm:$0xff] }
  0x27   : > { %956 = vmatprep.mubr.f32.mxu0 %v1635_v0  ;;  %675 = vperm.xlu1 %1563, %v597_v15   ;;  %v604_v58 = vld [vmem:[%s2419_s4 + $0x90] sm:$0xff]  ;;  %v1203_v61 = vld [vmem:[%s2421_s6] sm:$0xff]  ;;  %v1206_v63 = vld [vmem:[%s2421_s6 + $0x18] sm:$0xff] }
  0x28   : > { %v458_v2 = vld [vmem:[%s2422_s7 + $0x78] sm:$0xff]  ;;  %v473_v3 = vld [vmem:[%s2422_s7 + $0xf0] sm:$0xff]  ;;  %v472_v5 = vld [vmem:[%s2422_s7 + $0xe8] sm:$0xff] }
  0x29   : > { %v457_v4 = vld [vmem:[%s2422_s7 + $0x70] sm:$0xff]  ;;  %v456_v6 = vld [vmem:[%s2422_s7 + $0x68] sm:$0xff]  ;;  %v471_v7 = vld [vmem:[%s2422_s7 + $0xe0] sm:$0xff] }
  0x2a   : > { %1447 = vmatmul.mubr.msk.f32.gmra.mxu0 %vm352_vm1, %v557_v12  ;;  %v455_v8 = vld [vmem:[%s2422_s7 + $0x60] sm:$0xff]  ;;  %v470_v9 = vld [vmem:[%s2422_s7 + $0xd8] sm:$0xff]  ;;  %v469_v11 = vld [vmem:[%s2422_s7 + $0xd0] sm:$0xff] }
  0x2b   : > { %962 = vmatprep.mubr.f32.mxu0 %v1635_v0  ;;  %670 = vperm.xlu1 %1563, %v596_v17   ;;  %v454_v10 = vld [vmem:[%s2422_s7 + $0x58] sm:$0xff]  ;;  %v453_v12 = vld [vmem:[%s2422_s7 + $0x50] sm:$0xff]  ;;  %v468_v13 = vld [vmem:[%s2422_s7 + $0xc8] sm:$0xff] }
  0x2e   : > { %1448 = vmatmul.mubr.msk.f32.gmra.mxu0 %vm352_vm1, %v558_v14  ;;  %v452_v14 = vld [vmem:[%s2422_s7 + $0x48] sm:$0xff] }
  0x2f   : > { %968 = vmatprep.mubr.f32.mxu0 %v1635_v0  ;;  %665 = vperm.xlu1 %1563, %v595_v19  }
  0x32   : > { %1449 = vmatmul.mubr.msk.f32.gmra.mxu0 %vm352_vm1, %v559_v16 }
  0x33   : > { %974 = vmatprep.mubr.f32.mxu0 %v1635_v0  ;;  %660 = vperm.xlu1 %1563, %v594_v21  }
  0x36   : > { %1450 = vmatmul.mubr.msk.f32.gmra.mxu0 %vm352_vm1, %v560_v18 }
  0x37   : > { %980 = vmatprep.mubr.f32.mxu0 %v1635_v0  ;;  %655 = vperm.xlu1 %1563, %v593_v23  }
  0x3a   : > { %1451 = vmatmul.mubr.msk.f32.gmra.mxu0 %vm352_vm1, %v561_v20 }
  0x3b   : > { %986 = vmatprep.mubr.f32.mxu0 %v1635_v0  ;;  %645 = vperm.xlu1 %1563, %v591_v25  }
  0x3e   : > { %1452 = vmatmul.mubr.msk.f32.gmra.mxu0 %vm352_vm1, %v562_v22 }
  0x3f   : > { %992 = vmatprep.mubr.f32.mxu0 %v1635_v0  ;;  %640 = vperm.xlu1 %1563, %v590_v27  }
  0x42   : > { %1453 = vmatmul.mubr.msk.f32.gmra.mxu0 %vm352_vm1, %v563_v24 }
  0x43   : > { %998 = vmatprep.mubr.f32.mxu0 %v1635_v0  ;;  %635 = vperm.xlu1 %1563, %v589_v29  }
  0x46   : > { %1454 = vmatmul.mubr.msk.f32.gmra.mxu0 %vm352_vm1, %v564_v26 }
  0x47   : > { %1004 = vmatprep.mubr.f32.mxu0 %v1635_v0  ;;  %630 = vperm.xlu1 %1563, %v588_v31  }
  0x4a   : > { %1455 = vmatmul.mubr.msk.f32.gmra.mxu0 %vm352_vm1, %v565_v28 }
  0x4b   : > { %1010 = vmatprep.mubr.f32.mxu0 %v1635_v0  ;;  %625 = vperm.xlu1 %1563, %v587_v37  }
  0x4e   : > { %1456 = vmatmul.mubr.msk.f32.gmra.mxu0 %vm352_vm1, %v566_v30 }
  0x4f   : > { %1016 = vmatprep.mubr.f32.mxu0 %v1635_v0  ;;  %620 = vperm.xlu1 %1563, %v586_v39   ;;  %v465_v39 = vld [vmem:[%s2422_s7 + $0xb0] sm:$0xff] }
  0x52   : > { %1457 = vmatmul.mubr.msk.f32.gmra.mxu0 %vm352_vm1, %v567_v32 }
  0x53   : > { %1022 = vmatprep.mubr.f32.mxu0 %v1635_v0  ;;  %770 = vperm.xlu1 %1563, %v616_v46   ;;  %v592_v46 = vld [vmem:[%s2419_s4 + $0x30] sm:$0xff] }
  0x56   : > { %1458 = vmatmul.mubr.msk.f32.gmra.mxu0 %vm352_vm1, %v568_v33  ;;  %v467_v33 = vld [vmem:[%s2422_s7 + $0xc0] sm:$0xff] }
  0x57   : > { %1028 = vmatprep.mubr.f32.mxu0 %v1635_v0  ;;  %760 = vperm.xlu1 %1563, %v614_v48   ;;  %v447_v48 = vld [vmem:[%s2422_s7 + $0x20] sm:$0xff] }
  0x5a   : > { %1459 = vmatmul.mubr.msk.f32.gmra.mxu0 %vm352_vm1, %v569_v34 }
  0x5b   : > { %1034 = vmatprep.mubr.f32.mxu0 %v1635_v0  ;;  %750 = vperm.xlu1 %1563, %v612_v50   ;;  %v446_v50 = vld [vmem:[%s2422_s7 + $0x18] sm:$0xff] }
  0x5e   : > { %1460 = vmatmul.mubr.msk.f32.gmra.mxu0 %vm352_vm1, %v570_v35  ;;  %v451_v35 = vld [vmem:[%s2422_s7 + $0x40] sm:$0xff] }
  0x5f   : > { %1040 = vmatprep.mubr.f32.mxu0 %v1635_v0  ;;  %740 = vperm.xlu1 %1563, %v610_v52   ;;  %v461_v52 = vld [vmem:[%s2422_s7 + $0x90] sm:$0xff] }
  0x62   : > { %1461 = vmatmul.mubr.msk.f32.gmra.mxu0 %vm352_vm1, %v571_v36  ;;  %v466_v36 = vld [vmem:[%s2422_s7 + $0xb8] sm:$0xff] }
  0x63   : > { %1046 = vmatprep.mubr.f32.mxu0 %v1635_v0  ;;  %730 = vperm.xlu1 %1563, %v608_v54  }
  0x66   : > { %1462 = vmatmul.mubr.msk.f32.gmra.mxu0 %vm352_vm1, %v572_v38  ;;  %v450_v38 = vld [vmem:[%s2422_s7 + $0x38] sm:$0xff] }
  0x67   : > { %1052 = vmatprep.mubr.f32.mxu0 %v1635_v0  ;;  %720 = vperm.xlu1 %1563, %v606_v56   ;;  %v460_v56 = vld [vmem:[%s2422_s7 + $0x88] sm:$0xff] }
  0x6a   : > { %1463 = vmatmul.mubr.msk.f32.gmra.mxu0 %vm352_vm1, %v573_v40 }
  0x6b   : > { %1058 = vmatprep.mubr.f32.mxu0 %v1635_v0  ;;  %710 = vperm.xlu1 %1563, %v604_v58  }
  0x6e   : > { %1464 = vmatmul.mubr.msk.f32.gmra.mxu0 %vm352_vm1, %v574_v41  ;;  %v449_v41 = vld [vmem:[%s2422_s7 + $0x30] sm:$0xff] }
  0x6f   : > { %1064 = vmatprep.mubr.f32.mxu0 %v1635_v0  ;;  %700 = vperm.xlu1 %1563, %v602_v60   ;;  %v615_v60 = vld [vmem:[%s2419_s4 + $0xe8] sm:$0xff] }
  0x72   : > { %1465 = vmatmul.mubr.msk.f32.gmra.mxu0 %vm352_vm1, %v575_v42  ;;  %v464_v42 = vld [vmem:[%s2422_s7 + $0xa8] sm:$0xff] }
  0x73   : > { %1070 = vmatprep.mubr.f32.mxu0 %v1635_v0  ;;  %1209 = vperm.xlu1 %1563, %v1203_v61  }
  0x76   : > { %1466 = vmatmul.mubr.msk.f32.gmra.mxu0 %vm352_vm1, %v576_v43  ;;  %v448_v43 = vld [vmem:[%s2422_s7 + $0x28] sm:$0xff] }
  0x77   : > { %1076 = vmatprep.mubr.f32.mxu0 %v1635_v0  ;;  %1214 = vperm.xlu1 %1563, %v1204_v62   ;;  %v443_v62 = vld [vmem:[%s2422_s7] sm:$0xff] }
  0x7a   : > { %1467 = vmatmul.mubr.msk.f32.gmra.mxu0 %vm352_vm1, %v577_v44 }
  0x7b   : > { %1082 = vmatprep.mubr.f32.mxu0 %v1635_v0  ;;  %1224 = vperm.xlu1 %1563, %v1206_v63  }
  0x7e   : > { %1468 = vmatmul.mubr.msk.f32.gmra.mxu0 %vm352_vm1, %v578_v45  ;;  %v463_v45 = vld [vmem:[%s2422_s7 + $0xa0] sm:$0xff] }
  0x7f   : > { %1088 = vmatprep.mubr.f32.mxu0 %v1635_v0 }
  0x82   : > { %1469 = vmatmul.mubr.msk.f32.gmra.mxu0 %vm352_vm1, %v579_v47 }
  0x83   : > { %1094 = vmatprep.mubr.f32.mxu0 %v1635_v0 }
  0x86   : > { %1470 = vmatmul.mubr.msk.f32.gmra.mxu0 %vm352_vm1, %v580_v49  ;;  %v462_v49 = vld [vmem:[%s2422_s7 + $0x98] sm:$0xff] }
  0x87   : > { %1100 = vmatprep.mubr.f32.mxu0 %v1635_v0 }
  0x8a   : > { %1471 = vmatmul.mubr.msk.f32.gmra.mxu0 %vm352_vm1, %v581_v51 }
  0x8b   : > { %1106 = vmatprep.mubr.f32.mxu0 %v1635_v0 }
  0x8e   : > { %1472 = vmatmul.mubr.msk.f32.gmra.mxu0 %vm352_vm1, %v582_v53  ;;  %v617_v53 = vld [vmem:[%s2419_s4 + $0xf8] sm:$0xff] }
  0x8f   : > { %1112 = vmatprep.mubr.f32.mxu0 %v1635_v0 }
  0x91   : > { %v348_v15 = vpop.permute.xlu0 %347 }
  0x92   : > { %1473 = vmatmul.mubr.msk.f32.gmra.mxu0 %vm352_vm1, %v583_v55  ;;  %v445_v55 = vld [vmem:[%s2422_s7 + $0x10] sm:$0xff] }
  0x93   : > { %1118 = vmatprep.mubr.f32.mxu0 %v1635_v0 }
  0x96   : > { %1474 = vmatmul.mubr.msk.f32.gmra.mxu0 %vm352_vm1, %v584_v57  ;;  %v444_v57 = vld [vmem:[%s2422_s7 + $0x8] sm:$0xff] }
  0x97   : > { %1124 = vmatprep.mubr.f32.mxu0 %v1635_v0  ;;  %v474_v0 = vld [vmem:[%s2422_s7 + $0xf8] sm:$0xff] }
  0x98   : > { %1483 = vmatprep.subr.mxu1 %v474_v0  ;;  %v613_v0 = vld [vmem:[%s2419_s4 + $0xd8] sm:$0xff] }
  0x99   : > { %1484 = vmatpush3.msra.mxu1 %v458_v2 }
  0x9a   : > { %1475 = vmatmul.mubr.msk.f32.gmra.mxu0 %vm352_vm1, %v585_v59  ;;  %1485 = vmatprep.subr.mxu1 %v473_v3  ;;  %v459_v59 = vld [vmem:[%s2422_s7 + $0x80] sm:$0xff] }
  0x9b   : > { %1486 = vmatpush3.msra.mxu1 %v457_v4  ;;  %v611_v4 = vld [vmem:[%s2419_s4 + $0xc8] sm:$0xff] }
  0x9c   : > { %1487 = vmatprep.subr.mxu1 %v472_v5 }
  0x9d   : > { %1488 = vmatpush3.msra.mxu1 %v456_v6 }
  0x9e   : > { %1489 = vmatprep.subr.mxu1 %v471_v7  ;;  %v609_v7 = vld [vmem:[%s2419_s4 + $0xb8] sm:$0xff] }
  0x9f   : > { %1490 = vmatpush3.msra.mxu1 %v455_v8 }
  0xa0   : > { %1491 = vmatprep.subr.mxu1 %v470_v9 }
  0xa1   : > { %1492 = vmatpush3.msra.mxu1 %v454_v10  ;;  %v607_v10 = vld [vmem:[%s2419_s4 + $0xa8] sm:$0xff] }
  0xa2   : > { %1493 = vmatprep.subr.mxu1 %v469_v11 }
  0xa3   : > { %1494 = vmatpush3.msra.mxu1 %v453_v12 }
  0xa4   : > { %1495 = vmatprep.subr.mxu1 %v468_v13  ;;  %v605_v13 = vld [vmem:[%s2419_s4 + $0x98] sm:$0xff] }
  0xa5   : > { %1496 = vmatpush3.msra.mxu1 %v452_v14 }
  0xa6   : > { %1497 = vmatprep.subr.mxu1 %v467_v33 }
  0xa7   : > { %1498 = vmatpush3.msra.mxu1 %v451_v35 }
  0xa8   : > { %1499 = vmatprep.subr.mxu1 %v466_v36 }
  0xa9   : > { %1500 = vmatpush3.msra.mxu1 %v450_v38 }
  0xaa   : > { %1501 = vmatprep.subr.mxu1 %v465_v39 }
  0xab   : > { %1502 = vmatpush3.msra.mxu1 %v449_v41 }
  0xac   : > { %1503 = vmatprep.subr.mxu1 %v464_v42 }
  0xad   : > { %1504 = vmatpush3.msra.mxu1 %v448_v43 }
  0xae   : > { %1505 = vmatprep.subr.mxu1 %v463_v45 }
  0xaf   : > { %1506 = vmatpush3.msra.mxu1 %v447_v48 }
  0xb0   : > { %1507 = vmatprep.subr.mxu1 %v462_v49 }
  0xb1   : > { %1508 = vmatpush3.msra.mxu1 %v446_v50 }
  0xb2   : > { %1509 = vmatprep.subr.mxu1 %v461_v52 }
  0xb3   : > { %1510 = vmatpush3.msra.mxu1 %v445_v55 }
  0xb4   : > { %1511 = vmatprep.subr.mxu1 %v460_v56 }
  0xb5   : > { %1512 = vmatpush3.msra.mxu1 %v444_v57 }
  0xb6   : > { %1513 = vmatprep.subr.mxu1 %v459_v59 }
  0xb7   : > { %1514 = vmatpush3.msra.mxu1 %v443_v62 }
  0xde   : > { %v427_v16 = vpop.f32.mrf.mxu1  ;;  %v2039_v17 = vpop.f32.mrf.mxu0 }
  0xdf   : > { %v428_v18 = vadd.f32 %v427_v16, %v348_v15  ;;  %v603_v16 = vld [vmem:[%s2419_s4 + $0x88] sm:$0xff] }
  0xe0   : > { %v429_v19 = vpop.f32.mrf.mxu1  ;;  %v2041_v20 = vpop.f32.mrf.mxu0 }
  0xe1   : > { %v430_v21 = vadd.f32 %v429_v19, %v348_v15  ;;  %v2045_v23 = vmul.f32 100.0, %v428_v18  ;;  %v696_v19 = vpop.permute.xlu1 %695 }
  0xe2   : > { %v2043_v22 = vpop.f32.mrf.mxu0 }
  0xe3   : > { %v2047_v24 = vmul.f32 100.0, %v430_v21 }
  0xe4   : > { %v2049_v25 = vpop.f32.mrf.mxu0 }
  0xe5   : > { %v434_v26 = vmax.f32 %v2045_v23, %v2047_v24 }
  0xe6   : > { %v2053_v27 = vpop.f32.mrf.mxu0 }
  0xe7   : > { %435 = vmax.xlane.f32.xlu0 %v434_v26 }
  0xe8   : > { %v2055_v28 = vpop.f32.mrf.mxu0 }
  0xea   : > { %v2057_v29 = vpop.f32.mrf.mxu0 }
  0xec   : > { %v2059_v30 = vpop.f32.mrf.mxu0 }
  0xee   : > { %v2061_v31 = vpop.f32.mrf.mxu0 }
  0xf0   : > { %v2063_v32 = vpop.f32.mrf.mxu0 }
  0xf2   : > { %v2068_v34 = vpop.f32.mrf.mxu0 }
  0xf4   : > { %v2076_v37 = vpop.f32.mrf.mxu0 }
  0xf6   : > { %v2084_v40 = vpop.f32.mrf.mxu0 }
  0xf8   : > { %v2095_v44 = vpop.f32.mrf.mxu0 }
  0xfa   : > { %v2103_v47 = vpop.f32.mrf.mxu0 }
  0xfc   : > { %v2114_v51 = vpop.f32.mrf.mxu0 }
  0xfd   : > { %650 = vperm.xlu0 %1562, %v592_v46   ;;  %v691_v46 = vpop.permute.xlu1 %690 }
  0xfe   : > { %v2122_v54 = vpop.f32.mrf.mxu0 }
 0x100   : > { %v2133_v58 = vpop.f32.mrf.mxu0 }
 0x101   : > { %775 = vperm.xlu0 %1562, %v617_v53   ;;  %v686_v50 = vpop.permute.xlu1 %685 }
 0x102   : > { %v2141_v61 = vpop.f32.mrf.mxu0 }
 0x104   : > { %v2146_v63 = vpop.f32.mrf.mxu0 }
 0x105   : > { %765 = vperm.xlu0 %1562, %v615_v60   ;;  %v681_v53 = vpop.permute.xlu1 %680 }
 0x106   : > { %v2151_v2 = vpop.f32.mrf.mxu0 }
 0x108   : > { %v2153_v3 = vpop.f32.mrf.mxu0 }
 0x109   : > { %755 = vperm.xlu0 %1562, %v613_v0   ;;  %v676_v57 = vpop.permute.xlu1 %675 }
 0x10a   : > { %v2158_v5 = vpop.f32.mrf.mxu0 }
 0x10c   : > { %v2160_v6 = vpop.f32.mrf.mxu0 }
 0x10d   : > { %745 = vperm.xlu0 %1562, %v611_v4   ;;  %v671_v60 = vpop.permute.xlu1 %670 }
 0x10e   : > { %v2165_v8 = vpop.f32.mrf.mxu0 }
 0x110   : > { %v2167_v9 = vpop.f32.mrf.mxu0 }
 0x111   : > { %735 = vperm.xlu0 %1562, %v609_v7   ;;  %v666_v4 = vpop.permute.xlu1 %665 }
 0x112   : > { %v2172_v11 = vpop.f32.mrf.mxu0 }
 0x114   : > { %v1020_v12 = vpop.f32.mrf.mxu0 }
 0x115   : > { %725 = vperm.xlu0 %1562, %v607_v10   ;;  %v2214_v10 = vpop.permute.xlu1 %660 }
 0x116   : > { %v1024_v14 = vpop.f32.mrf.mxu0 }
 0x118   : > { %v1026_v15 = vpop.f32.mrf.mxu0 }
 0x119   : > { %715 = vperm.xlu0 %1562, %v605_v13  }
 0x11a   : > { %v1030_v18 = vpop.f32.mrf.mxu0 }
 0x11c   : > { %v1032_v21 = vpop.f32.mrf.mxu0 }
 0x11d   : > { %705 = vperm.xlu0 %1562, %v603_v16   ;;  %v1033_v26 = vadd.f32 %v1032_v21, %v696_v19  ;;  %v2220_v21 = vpop.permute.xlu1 %655 }
 0x11e   : > { %v2180_v35 = vpop.f32.mrf.mxu0 }
 0x11f   : > { %v1162_v33 = vmax.f32 %v1033_v26, 0.0  ;;  %2429 = vst [vmem:[#allocation5_spill] sm:$0xff] %v2180_v35 }
 0x120   : > { %v2182_v36 = vpop.f32.mrf.mxu0 }
 0x121   : > { %1227 = vmatprep.subr.mxu1 %v1162_v33  ;;  %2430 = vst [vmem:[#allocation6_spill] sm:$0xff] %v2182_v36  ;;  %v2224_v33 = vpop.permute.xlu1 %645 }
 0x122   : > { %v2184_v38 = vpop.f32.mrf.mxu0 }
 0x123   : > { %2431 = vst [vmem:[#allocation7_spill] sm:$0xff] %v2184_v38 }
 0x124   : > { %v2186_v39 = vpop.f32.mrf.mxu0 }
 0x125   : > { %2432 = vst [vmem:[#allocation8_spill] sm:$0xff] %v2186_v39 }
 0x126   : > { %v2188_v41 = vpop.f32.mrf.mxu0 }
 0x127   : > { %2433 = vst [vmem:[#allocation9_spill] sm:$0xff] %v2188_v41 }
 0x128   : > { %v2190_v42 = vpop.f32.mrf.mxu0 }
 0x129   : > { %2434 = vst [vmem:[#allocation10_spill] sm:$0xff] %v2190_v42 }
 0x12a   : > { %v2192_v43 = vpop.f32.mrf.mxu0 }
 0x12b   : > { %2435 = vst [vmem:[#allocation11_spill] sm:$0xff] %v2192_v43  ;;  %v2232_v43 = vpop.permute.xlu1 %640 }
 0x12c   : > { %v2194_v45 = vpop.f32.mrf.mxu0 }
 0x12d   : > { %2436 = vst [vmem:[#allocation12_spill] sm:$0xff] %v2194_v45 }
 0x12e   : > { %v2196_v48 = vpop.f32.mrf.mxu0 }
 0x12f   : > { %2437 = vst [vmem:[#allocation13_spill] sm:$0xff] %v2196_v48  ;;  %v2236_v48 = vpop.permute.xlu1 %635 }
 0x130   : > { %v2198_v49 = vpop.f32.mrf.mxu0 }
 0x131   : > { %2438 = vst [vmem:[#allocation14_spill] sm:$0xff] %v2198_v49 }
 0x132   : > { %v2200_v52 = vpop.f32.mrf.mxu0 }
 0x133   : > { %2439 = vst [vmem:[#allocation15_spill] sm:$0xff] %v2200_v52  ;;  %v1031_v52 = vadd.f32 %v1030_v18, %v696_v19  ;;  %v1009_v19 = vadd.f32 %v2160_v6, %v676_v57 }
 0x134   : > { %v2202_v55 = vpop.f32.mrf.mxu0 }
 0x135   : > { %2440 = vst [vmem:[#allocation16_spill] sm:$0xff] %v2202_v55  ;;  %v1027_v55 = vadd.f32 %v1026_v15, %v691_v46  ;;  %v1013_v15 = vadd.f32 %v2165_v8, %v681_v53  ;;  %v1154_v6 = vmax.f32 %v1009_v19, 0.0 }
 0x136   : > { %v2204_v56 = vpop.f32.mrf.mxu0 }
 0x137   : > { %2441 = vst [vmem:[#allocation17_spill] sm:$0xff] %v2204_v56  ;;  %v1025_v56 = vadd.f32 %v1024_v14, %v691_v46  ;;  %v1007_v46 = vadd.f32 %v2158_v5, %v676_v57  ;;  %v1155_v8 = vmax.f32 %v1013_v15, 0.0  ;;  %v997_v57 = vadd.f32 %v2146_v63, %v666_v4 }
 0x138   : > { %v2206_v59 = vpop.f32.mrf.mxu0  ;;  %v985_v63 = vadd.f32 %v2114_v51, %v2220_v21  ;;  %v973_v51 = vadd.f32 %v2076_v37, %v2224_v33  ;;  %v961_v37 = vadd.f32 %v2059_v30, %v2236_v48 }
 0x139   : > { %2442 = vst [vmem:[#allocation18_spill] sm:$0xff] %v2206_v59  ;;  %v1161_v59 = vmax.f32 %v1031_v52, 0.0  ;;  %v1159_v14 = vmax.f32 %v1025_v56, 0.0 }
 0x13a   : > { %v2208_v62 = vpop.f32.mrf.mxu0  ;;  %v1138_v30 = vmax.f32 %v961_v37, 0.0 }
 0x13b   : > { %2443 = vst [vmem:[#allocation19_spill] sm:$0xff] %v2208_v62  ;;  %v1160_v62 = vmax.f32 %v1027_v55, 0.0 }
 0x13c   : > { %v2210_v0 = vpop.f32.mrf.mxu0 }
 0x13d   : > { %2444 = vst [vmem:[#allocation20_spill] sm:$0xff] %v2210_v0  ;;  %v1196_v0 = vld [vmem:[%s2420_s5 + $0x8] sm:$0xff] }
 0x13e   : > { %v2212_v7 = vpop.f32.mrf.mxu0 }
 0x140   : > { %v2216_v13 = vpop.f32.mrf.mxu0 }
 0x142   : > { %v2218_v16 = vpop.f32.mrf.mxu0 }
 0x144   : > { %v2222_v26 = vpop.f32.mrf.mxu0 }
 0x146   : > { %v2226_v1 = vpop.f32.mrf.mxu0 }
 0x148   : > { %v2230_v42 = vpop.f32.mrf.mxu0 }
 0x14a   : > { %v2234_v45 = vpop.f32.mrf.mxu0 }
 0x14c   : > { %v2238_v49 = vpop.f32.mrf.mxu0 }
 0x170   : > { %v436_v35 = vpop.xlane.xlu0 %435 }
 0x171   : > { %v437_v36 = vsub.f32 %v2045_v23, %v436_v35  ;;  %v438_v38 = vsub.f32 %v2047_v24, %v436_v35  ;;  %v2240_v23 = vpop.f32.mrf.mxu0  ;;  %v1021_v24 = vadd.f32 %v1020_v12, %v686_v50  ;;  %v2242_v35 = vpop.permute.xlu1 %630 }
 0x173   : > { %v439_v39 = vmul.f32 1.442695, %v437_v36  ;;  %v441_v41 = vmul.f32 1.442695, %v438_v38  ;;  %v1019_v38 = vadd.f32 %v2172_v11, %v686_v50  ;;  %v2250_v18 = vpop.f32.mrf.mxu0  ;;  %v1158_v12 = vmax.f32 %v1021_v24, 0.0 }
 0x174   : > { %v1003_v50 = vadd.f32 %v2153_v3, %v671_v60  ;;  %v1153_v24 = vmax.f32 %v1007_v46, 0.0  ;;  %v995_v3 = vadd.f32 %v2141_v61, %v666_v4  ;;  %v983_v4 = vadd.f32 %v2103_v47, %v2220_v21 }
 0x175   : > { %1567 = vpow2.f32 %v439_v39  ;;  %v1157_v11 = vmax.f32 %v1019_v38, 0.0  ;;  %v2255_v52 = vpop.permute.xlu1 %625  ;;  %v2258_v55 = vpop.f32.mrf.mxu0  ;;  %v1150_v38 = vmax.f32 %v997_v57, 0.0  ;;  %v971_v47 = vadd.f32 %v2068_v34, %v2224_v33 }
 0x176   : > { %1569 = vpow2.f32 %v441_v41  ;;  %v1015_v41 = vadd.f32 %v2167_v9, %v681_v53  ;;  %v1001_v53 = vadd.f32 %v2151_v2, %v671_v60  ;;  %v1152_v5 = vmax.f32 %v1003_v50, 0.0 }
 0x177   : > { %v991_v2 = vadd.f32 %v2133_v58, %v2214_v10  ;;  %v989_v60 = vadd.f32 %v2122_v54, %v2214_v10  ;;  %v1149_v61 = vmax.f32 %v995_v3, 0.0  ;;  %v1141_v50 = vmax.f32 %v971_v47, 0.0 }
 0x178   : > { %v1156_v9 = vmax.f32 %v1015_v41, 0.0  ;;  %v651_v56 = vpop.permute.xlu0 %650  ;;  %v959_v34 = vadd.f32 %v2057_v29, %v2236_v48  ;;  %v947_v48 = vadd.f32 %v2043_v22, %v2255_v52 }
 0x179   : > { %v1148_v58 = vmax.f32 %v991_v2, 0.0  ;;  %v979_v41 = vadd.f32 %v2095_v44, %v651_v56  ;;  %v1147_v54 = vmax.f32 %v989_v60, 0.0  ;;  %v977_v10 = vadd.f32 %v2084_v40, %v651_v56 }
 0x17a   : > { %v967_v44 = vadd.f32 %v2063_v32, %v2232_v43  ;;  %v965_v40 = vadd.f32 %v2061_v31, %v2232_v43  ;;  %v953_v43 = vadd.f32 %v2053_v27, %v2242_v35  ;;  %v1137_v29 = vmax.f32 %v959_v34, 0.0 }
 0x17b   : > { %v1143_v46 = vmax.f32 %v977_v10, 0.0  ;;  %v1133_v2 = vmax.f32 %v947_v48, 0.0 }
 0x17c   : > { %v1140_v32 = vmax.f32 %v967_v44, 0.0  ;;  %v1139_v31 = vmax.f32 %v965_v40, 0.0  ;;  %v1135_v57 = vmax.f32 %v953_v43, 0.0  ;;  %v2449_v43 = vld [vmem:[#allocation16_spill] sm:$0xff] }
 0x182   : > { %v1568_v36 = vpop.eup %1567 }
 0x183   : > { %v1570_v39 = vpop.eup %1569 }
 0x184   : > { %539 = vmatprep.mubr.f32.mxu1 %v1570_v39 }
 0x185   : > { %540 = vmatmul.mubr.f32.vlgmr.msra.gmra.mxu1 %v1568_v36  ;;  %v2268_v36 = vpop.permute.xlu0 %775 }
 0x186   : > { %1228 = vmatpush1.msra.mxu1 %v1161_v59  ;;  %1291 = vmatprep.mubr.f32.mxu1 %v1196_v0  ;;  %v1151_v59 = vmax.f32 %v1001_v53, 0.0  ;;  %v2262_v0 = vpop.f32.mrf.mxu0  ;;  %v955_v53 = vadd.f32 %v2055_v28, %v2242_v35 }
 0x187   : > { %1229 = vmatprep.subr.mxu1 %v1160_v62  ;;  %v621_v62 = vpop.permute.xlu1 %620 }
 0x188   : > { %1230 = vmatpush1.msra.mxu1 %v1159_v14  ;;  %v1120_v39 = vpop.f32.mrf.mxu0  ;;  %v1146_v14 = vmax.f32 %v985_v63, 0.0  ;;  %v943_v28 = vadd.f32 %v2041_v20, %v621_v62  ;;  %v941_v27 = vadd.f32 %v2039_v17, %v621_v62 }
 0x189   : > { %1231 = vmatprep.subr.mxu1 %v1158_v12  ;;  %v1145_v12 = vmax.f32 %v983_v4, 0.0  ;;  %v766_v19 = vpop.permute.xlu0 %765 }
 0x18a   : > { %1232 = vmatpush1.msra.mxu1 %v1157_v11  ;;  %v1122_v21 = vpop.f32.mrf.mxu0  ;;  %v1144_v11 = vmax.f32 %v979_v41, 0.0  ;;  %v1131_v20 = vmax.f32 %v941_v27, 0.0  ;;  %v1117_v62 = vadd.f32 %v2262_v0, %v766_v19 }
 0x18b   : > { %1233 = vmatprep.subr.mxu1 %v1156_v9  ;;  %v771_v15 = vpop.permute.xlu1 %770  ;;  %v1142_v9 = vmax.f32 %v973_v51, 0.0 }
 0x18c   : > { %1234 = vmatpush1.msra.mxu1 %v1155_v8  ;;  %v1126_v33 = vpop.f32.mrf.mxu0  ;;  %v1123_v3 = vadd.f32 %v1122_v21, %v771_v15  ;;  %v1121_v60 = vadd.f32 %v1120_v39, %v771_v15  ;;  %v1115_v39 = vadd.f32 %v2258_v55, %v766_v19  ;;  %v1190_v15 = vmax.f32 %v1117_v62, 0.0 }
 0x18d   : > { %1235 = vmatprep.subr.mxu1 %v1154_v6  ;;  %v756_v56 = vpop.permute.xlu0 %755  ;;  %v949_v6 = vadd.f32 %v2049_v25, %v2255_v52  ;;  %v1127_v22 = vadd.f32 %v1126_v33, %v2268_v36  ;;  %v2447_v33 = vld [vmem:[#allocation18_spill] sm:$0xff] }
 0x18e   : > { %1236 = vmatpush1.msra.mxu1 %v1153_v24  ;;  %v1128_v24 = vpop.f32.mrf.mxu0  ;;  %v1192_v63 = vmax.f32 %v1123_v3, 0.0  ;;  %v1191_v4 = vmax.f32 %v1121_v60, 0.0  ;;  %v1189_v51 = vmax.f32 %v1115_v39, 0.0  ;;  %v1103_v0 = vadd.f32 %v2234_v45, %v756_v56  ;;  %v2453_v3 = vld [vmem:[#allocation12_spill] sm:$0xff]  ;;  %v2454_v60 = vld [vmem:[#allocation11_spill] sm:$0xff] }
 0x18f   : > { %1237 = vmatprep.subr.mxu1 %v1152_v5  ;;  %v761_v8 = vpop.permute.xlu1 %760  ;;  %v1136_v5 = vmax.f32 %v955_v53, 0.0  ;;  %v1129_v25 = vadd.f32 %v1128_v24, %v2268_v36  ;;  %v2451_v24 = vld [vmem:[#allocation14_spill] sm:$0xff] }
 0x190   : > { %1238 = vmatpush1.msra.mxu1 %v1151_v59  ;;  %v1134_v59 = vmax.f32 %v949_v6, 0.0  ;;  %v1111_v17 = vadd.f32 %v2250_v18, %v761_v8  ;;  %v1109_v41 = vadd.f32 %v2240_v23, %v761_v8  ;;  %v1185_v19 = vmax.f32 %v1103_v0, 0.0  ;;  %v2450_v6 = vld [vmem:[#allocation15_spill] sm:$0xff]  ;;  %v2460_v0 = vld [vmem:[#allocation5_spill] sm:$0xff] }
 0x191   : > { %1239 = vmatprep.subr.mxu1 %v1150_v38  ;;  %v746_v52 = vpop.permute.xlu0 %745  ;;  %v1132_v38 = vmax.f32 %v943_v28, 0.0 }
 0x192   : > { %1240 = vmatpush1.msra.mxu1 %v1149_v61  ;;  %v1194_v61 = vmax.f32 %v1129_v25, 0.0  ;;  %v1188_v10 = vmax.f32 %v1111_v17, 0.0  ;;  %v1187_v18 = vmax.f32 %v1109_v41, 0.0  ;;  %v1093_v21 = vadd.f32 %v2222_v26, %v746_v52  ;;  %v2446_v26 = vld [vmem:[#allocation19_spill] sm:$0xff]  ;;  %v2456_v17 = vld [vmem:[#allocation9_spill] sm:$0xff] }
 0x193   : > { %1241 = vmatprep.subr.mxu1 %v1148_v58  ;;  %v751_v35 = vpop.permute.xlu1 %750  ;;  %v1193_v58 = vmax.f32 %v1127_v22, 0.0 }
 0x194   : > { %1242 = vmatpush1.msra.mxu1 %v1147_v54  ;;  %v1097_v23 = vadd.f32 %v2226_v1, %v751_v35  ;;  %v1182_v1 = vmax.f32 %v1093_v21, 0.0 }
 0x195   : > { %1243 = vmatprep.subr.mxu1 %v1146_v14  ;;  %v736_v54 = vpop.permute.xlu0 %735  ;;  %v1105_v14 = vadd.f32 %v2238_v49, %v756_v56  ;;  %v1091_v49 = vadd.f32 %v2218_v16, %v746_v52 }
 0x196   : > { %1244 = vmatpush1.msra.mxu1 %v1145_v12  ;;  %v1099_v12 = vadd.f32 %v2230_v42, %v751_v35  ;;  %v1183_v40 = vmax.f32 %v1097_v23, 0.0 }
 0x197   : > { %1245 = vmatprep.subr.mxu1 %v1144_v11  ;;  %v741_v36 = vpop.permute.xlu1 %740  ;;  %v1186_v47 = vmax.f32 %v1105_v14, 0.0  ;;  %v1181_v37 = vmax.f32 %v1091_v49, 0.0  ;;  %v2459_v14 = vld [vmem:[#allocation6_spill] sm:$0xff]  ;;  %v1198_v49 = vld [vmem:[%s2420_s5 + $0x18] sm:$0xff] }
 0x198   : > { %1246 = vmatpush1.msra.mxu1 %v1143_v46  ;;  %v1184_v11 = vmax.f32 %v1099_v12, 0.0  ;;  %v1087_v45 = vadd.f32 %v2216_v13, %v741_v36  ;;  %v1085_v42 = vadd.f32 %v2212_v7, %v741_v36  ;;  %v2445_v46 = vld [vmem:[#allocation20_spill] sm:$0xff]  ;;  %v2448_v13 = vld [vmem:[#allocation17_spill] sm:$0xff] }
 0x199   : > { %1247 = vmatprep.subr.mxu1 %v1142_v9  ;;  %v726_v44 = vpop.permute.xlu0 %725  ;;  %v1081_v9 = vadd.f32 %v2445_v46, %v736_v54 }
 0x19a   : > { %1248 = vmatpush1.msra.mxu1 %v1141_v50  ;;  %v1079_v50 = vadd.f32 %v2446_v26, %v736_v54  ;;  %v1180_v16 = vmax.f32 %v1087_v45, 0.0  ;;  %v1069_v56 = vadd.f32 %v2449_v43, %v726_v44  ;;  %v2458_v54 = vld [vmem:[#allocation7_spill] sm:$0xff]  ;;  %v1637_v45 = vmov 2  }
 0x19b   : > { %1249 = vmatprep.subr.mxu1 %v1140_v32  ;;  %v731_v55 = vpop.permute.xlu1 %730  ;;  %v1179_v32 = vmax.f32 %v1085_v42, 0.0  ;;  %v1178_v7 = vmax.f32 %v1081_v9, 0.0  ;;  %1564 = vset.pattern.permute.xlu0 %v1637_v45  ;;  %v1202_v42 = vld [vmem:[%s2420_s5 + $0x38] sm:$0xff]  ;;  %v1205_v26 = vld [vmem:[%s2421_s6 + $0x10] sm:$0xff] }
 0x19c   : > { %1250 = vmatpush1.msra.mxu1 %v1139_v31  ;;  %v1075_v8 = vadd.f32 %v2447_v33, %v731_v55  ;;  %v1073_v53 = vadd.f32 %v2448_v13, %v731_v55 }
 0x19d   : > { %1251 = vmatprep.subr.mxu1 %v1138_v30  ;;  %v716_v31 = vpop.permute.xlu0 %715  ;;  %v1177_v30 = vmax.f32 %v1079_v50, 0.0  ;;  %v2461_v50 = vmov 0  }
 0x19e   : > { %1252 = vmatpush1.msra.mxu1 %v1137_v29  ;;  %v1067_v29 = vadd.f32 %v2450_v6, %v726_v44  ;;  %v1176_v48 = vmax.f32 %v1075_v8, 0.0  ;;  %v1175_v28 = vmax.f32 %v1073_v53, 0.0  ;;  %v1057_v25 = vadd.f32 %v2453_v3, %v716_v31  ;;  %v1197_v44 = vld [vmem:[%s2420_s5 + $0x10] sm:$0xff] }
 0x19f   : > { %1253 = vmatprep.subr.mxu1 %v1136_v5  ;;  %v721_v34 = vpop.permute.xlu1 %720  ;;  %v1055_v22 = vadd.f32 %v2454_v60, %v716_v31 }
 0x1a0   : > { %1254 = vmatpush1.msra.mxu1 %v1135_v57  ;;  %v1063_v5 = vadd.f32 %v2451_v24, %v721_v34  ;;  %v2452_v57 = vld [vmem:[#allocation13_spill] sm:$0xff] }
 0x1a1   : > { %1255 = vmatprep.subr.mxu1 %v1134_v59  ;;  %v1061_v27 = vadd.f32 %v2452_v57, %v721_v34  ;;  %v1174_v59 = vmax.f32 %v1069_v56, 0.0  ;;  %v706_v52 = vpop.permute.xlu0 %705  ;;  %v1169_v39 = vmax.f32 %v1055_v22, 0.0 }
 0x1a2   : > { %1256 = vmatpush1.msra.mxu1 %v1133_v2  ;;  %v1173_v2 = vmax.f32 %v1067_v29, 0.0 }
 0x1a3   : > { %1257 = vmatprep.subr.mxu1 %v1132_v38  ;;  %v711_v35 = vpop.permute.xlu1 %710  ;;  %v1172_v38 = vmax.f32 %v1063_v5, 0.0 }
 0x1a4   : > { %1258 = vmatpush1.msra.mxu1 %v1131_v20  ;;  %v2455_v20 = vld [vmem:[#allocation10_spill] sm:$0xff]  ;;  %v1049_v62 = vadd.f32 %v2456_v17, %v711_v35 }
 0x1a5   : > { %1259 = vmatprep.subr.mxu1 %v1194_v61  ;;  %v1171_v61 = vmax.f32 %v1061_v27, 0.0 }
 0x1a6   : > { %1260 = vmatpush2.msra.mxu1 %v1193_v58  ;;  %v2457_v58 = vld [vmem:[#allocation8_spill] sm:$0xff] }
 0x1a7   : > { %1261 = vmatprep.subr.mxu1 %v1192_v63  ;;  %v1051_v63 = vadd.f32 %v2455_v20, %v711_v35  ;;  %v1045_v41 = vadd.f32 %v2457_v58, %v706_v52  ;;  %v701_v36 = vpop.permute.xlu1 %700 }
 0x1a8   : > { %1262 = vmatpush2.msra.mxu1 %v1191_v4  ;;  %v1170_v4 = vmax.f32 %v1057_v25, 0.0  ;;  %v1037_v12 = vadd.f32 %v2460_v0, %v701_v36 }
 0x1a9   : > { %1263 = vmatprep.subr.mxu1 %v1190_v15  ;;  %v1168_v15 = vmax.f32 %v1051_v63, 0.0  ;;  %v1166_v23 = vmax.f32 %v1045_v41, 0.0 }
 0x1aa   : > { %1264 = vmatpush2.msra.mxu1 %v1189_v51  ;;  %v1167_v51 = vmax.f32 %v1049_v62, 0.0  ;;  %v1163_v21 = vmax.f32 %v1037_v12, 0.0 }
 0x1ab   : > { %1265 = vmatprep.subr.mxu1 %v1188_v10  ;;  %v1043_v10 = vadd.f32 %v2458_v54, %v706_v52  ;;  %v1210_v34 = vpop.permute.xlu1 %1209 }
 0x1ac   : > { %1266 = vmatpush2.msra.mxu1 %v1187_v18  ;;  %v1039_v18 = vadd.f32 %v2459_v14, %v701_v36 }
 0x1ad   : > { %1267 = vmatprep.subr.mxu1 %v1186_v47  ;;  %v1165_v55 = vmax.f32 %v1043_v10, 0.0 }
 0x1ae   : > { %1268 = vmatpush2.msra.mxu1 %v1185_v19  ;;  %v1164_v47 = vmax.f32 %v1039_v18, 0.0  ;;  %v1195_v19 = vld [vmem:[%s2420_s5] sm:$0xff] }
 0x1af   : > { %1269 = vmatprep.subr.mxu1 %v1184_v11  ;;  %v1200_v11 = vld [vmem:[%s2420_s5 + $0x28] sm:$0xff]  ;;  %v1215_v13 = vpop.permute.xlu1 %1214 }
 0x1b0   : > { %1270 = vmatpush2.msra.mxu1 %v1183_v40  ;;  %v1199_v40 = vld [vmem:[%s2420_s5 + $0x20] sm:$0xff] }
 0x1b1   : > { %1271 = vmatprep.subr.mxu1 %v1182_v1  ;;  %v1201_v1 = vld [vmem:[%s2420_s5 + $0x30] sm:$0xff] }
 0x1b2   : > { %1272 = vmatpush2.msra.mxu1 %v1181_v37 }
 0x1b3   : > { %1273 = vmatprep.subr.mxu1 %v1180_v16  ;;  %v1225_v6 = vpop.permute.xlu1 %1224 }
 0x1b4   : > { %1274 = vmatpush2.msra.mxu1 %v1179_v32 }
 0x1b5   : > { %1275 = vmatprep.subr.mxu1 %v1178_v7 }
 0x1b6   : > { %1276 = vmatpush2.msra.mxu1 %v1177_v30 }
 0x1b7   : > { %1277 = vmatprep.subr.mxu1 %v1176_v48 }
 0x1b8   : > { %1278 = vmatpush2.msra.mxu1 %v1175_v28 }
 0x1b9   : > { %1279 = vmatprep.subr.mxu1 %v1174_v59 }
 0x1ba   : > { %1280 = vmatpush2.msra.mxu1 %v1173_v2 }
 0x1bb   : > { %1281 = vmatprep.subr.mxu1 %v1172_v38 }
 0x1bc   : > { %1282 = vmatpush2.msra.mxu1 %v1171_v61 }
 0x1bd   : > { %1283 = vmatprep.subr.mxu1 %v1170_v4 }
 0x1be   : > { %1284 = vmatpush2.msra.mxu1 %v1169_v39 }
 0x1bf   : > { %1285 = vmatprep.subr.mxu1 %v1168_v15 }
 0x1c0   : > { %1286 = vmatpush2.msra.mxu1 %v1167_v51 }
 0x1c1   : > { %1287 = vmatprep.subr.mxu1 %v1166_v23 }
 0x1c2   : > { %1288 = vmatpush2.msra.mxu1 %v1165_v55 }
 0x1c3   : > { %1289 = vmatprep.subr.mxu1 %v1164_v47 }
 0x1c4   : > { %1290 = vmatpush2.msra.mxu1 %v1163_v21 }
 0x1c5   : > { %1292 = vmatmul.mubr.f32.vlgmr.msra.gmra.mxu1 %v1195_v19 }
 0x1c6   : > { %1297 = vmatprep.mubr.f32.mxu1 %v1198_v49 }
 0x1c9   : > { %1298 = vmatmul.mubr.f32.gmra.mxu1 %v1197_v44 }
 0x1ca   : > { %1303 = vmatprep.mubr.f32.mxu1 %v1200_v11 }
 0x1cd   : > { %1304 = vmatmul.mubr.f32.gmra.mxu1 %v1199_v40 }
 0x1ce   : > { %1309 = vmatprep.mubr.f32.mxu1 %v1202_v42 }
 0x1d1   : > { %1310 = vmatmul.mubr.f32.gmra.mxu1 %v1201_v1 }
 0x245   : > { %v1515_v46 = vpop.f32.mrf.mxu1 }
 0x247   : > { %v1516_v9 = vpop.f32.mrf.mxu1 }
 0x248   : > { %v2349_v37 = vadd.f32 %v1516_v9, %v1515_v46 }
 0x24a   : > { %547 = vperm.xlu0 %1564, %v2349_v37  }
 0x24e   : > { %1565 = vset.pattern.permute.xlu0 %v2461_v50 }
 0x24f   : > { %1219 = vperm.xlu0 %1565, %v1205_v26  }
 0x285   : > { %v1293_v16 = vpop.f32.mrf.mxu1 }
 0x286   : > { %v1294_v33 = vadd.f32 %v1293_v16, %v1210_v34 }
 0x287   : > { %v1295_v8 = vpop.f32.mrf.mxu1 }
 0x288   : > { %1316 = vst [vmem:[%s332_s28] sm:$0xff] %v1294_v33  ;;  %v1296_v32 = vadd.f32 %v1295_v8, %v1210_v34 }
 0x289   : > { %v1299_v53 = vpop.f32.mrf.mxu1 }
 0x28a   : > { %1317 = vst [vmem:[%s332_s28 + $0x8] sm:$0xff] %v1296_v32  ;;  %v1300_v31 = vadd.f32 %v1299_v53, %v1215_v13 }
 0x28b   : > { %v1301_v7 = vpop.f32.mrf.mxu1 }
 0x28c   : > { %1318 = vst [vmem:[%s332_s28 + $0x10] sm:$0xff] %v1300_v31  ;;  %v1302_v43 = vadd.f32 %v1301_v7, %v1215_v13 }
 0x28d   : > { %v1305_v56 = vpop.f32.mrf.mxu1 }
 0x28e   : > { %1319 = vst [vmem:[%s332_s28 + $0x18] sm:$0xff] %v1302_v43 }
 0x28f   : > { %v1307_v30 = vpop.f32.mrf.mxu1 }
 0x291   : > { %v1311_v29 = vpop.f32.mrf.mxu1 }
 0x292   : > { %v1312_v48 = vadd.f32 %v1311_v29, %v1225_v6 }
 0x293   : > { %v1313_v24 = vpop.f32.mrf.mxu1 }
 0x294   : > { %1322 = vst [vmem:[%s332_s28 + $0x30] sm:$0xff] %v1312_v48  ;;  %v1314_v5 = vadd.f32 %v1313_v24, %v1225_v6 }
 0x296   : > { %1323 = vst [vmem:[%s332_s28 + $0x38] sm:$0xff] %v1314_v5 }
 0x2c5   : > { %v548_v28 = vpop.permute.xlu0 %547 }
 0x2c6   : > { %1571 = vrcp.f32 %v548_v28 }
 0x2ca   : > { %v1220_v57 = vpop.permute.xlu0 %1219 }
 0x2cb   : > { %v1306_v27 = vadd.f32 %v1305_v56, %v1220_v57  ;;  %v1308_v35 = vadd.f32 %v1307_v30, %v1220_v57 }
 0x2cd   : > { %1320 = vst [vmem:[%s332_s28 + $0x20] sm:$0xff] %v1306_v27  ;;  %1321 = vst [vmem:[%s332_s28 + $0x28] sm:$0xff] %v1308_v35 }
 0x2ce   : > { %1586 = shalt.err (!%p1583_p3)
}
 0x2cf   : > { %s1587_s26 = scalar_lea.hbm %s2363_s23, 1024  ;;  %s1591_s17 = scalar_lea.hbm %s2424_s9, 4096 }
 0x2d0   : > { %p1588_p4 = scmp.ne.s32.totalorder %s2363_s23, %s1587_s26  ;;  %p1592_p9 = scmp.lt.s32.totalorder %s2363_s23, %s2424_s9 }
 0x2d1   : > { %p1593_p10 = scmp.lt.s32.totalorder %s1591_s17, %s1587_s26 }
 0x2d2   : > { %p1589_p7 = pnand %p1588_p4, %p1729_p5 }
 0x2d3   : > { %p1594_p11 = por %p1593_p10, %p1592_p9 }
 0x2d4   : > { %p1590_p8 = pneg %p1589_p7 }
 0x2d6   : > { %p1595_p12 = pnand %p1594_p11, %p1590_p8 }
 0x2d8   : > { %1598 = shalt.err (!%p1595_p12)
}
 0x2d9   : > { %s1639_s13 = smov 256   ;;  %s1640_s27 = smov 16   ;;  %v1572_v59 = vpop.eup %1571  ;;  %vm552_vm2 = vcmask 15360  }
 0x2da   : > { %1518 = dma.vmem_to_hbm [thread:$0]  (%p1729_p5), %s2365_s14, 1024, %s2363_s23, %s2369_s24, %s1639_s13, %s1639_s13, %s1640_s27   ;;  %v551_v3 = vmul.f32 %v1572_v59, %v2349_v37 }
 0x2db   : > { %s2462_s29 = sshll.u32 %s1743_s21, 3 }
 0x2dc   : > { %s341_s22 = scalar_lea.vmem %s2423_s8, %s2462_s29 }
 0x2dd   : > { %553 = vst.msk [vmem:[%s341_s22] sm:$0xff] %vm552_vm2, %v551_v3 }
 0x2de PF: > { %p1524_p13 = scmp.ge.s32.totalorder %s1633_s12, 2  ;;  %s1367_s26 = sand.u32 1, %s1621_s30  }
 0x2df   : > { %s1368_s19 = scalar_lea.sflag [#allocation3], %s1367_s26 }
 0x2e0   : > { %p1521_p0 = pnand %p1524_p13, %p1733_p6 }
 0x2e2   : > { %p1522_p1 = pneg %p1521_p0 }
 0x2e4   : > { %1616 = dma.done.wait (%p1522_p1), %s1368_s19, 1024  }
 0x2e5   : > { %1618 = vsyncadd (%p1522_p1), %s1368_s19, 4294966272  ;;  %p20_p5 = scmp.ge.s32.totalorder %s1716_s15, 6   ;;  %s2463_s30 = smov %s1625_s10 }
 0x2e6   : > { %s2464_s10 = smov %s1629_s11  ;;  %s2465_s11 = smov %s1727_s18 }
 0x2e7   : > { %s2466_s12 = smov %s1716_s15  ;;  %22 = sbr.rel (!%p20_p5) target bundleno = 3 (0x3), region = 99 }
 0x2ec   :  { %1373 = vsyncpa [#allocation3], 1 }
 0x2ed   :  { %1375 = vsyncpa [#allocation3 + $0x1], 1 }

</bundles_post_ra>
